<compile_context>
chip_gen: v6e
topology: v6e:2x2x1
jax: 0.10.0
libtpu: 0.0.40
codegen_flags: <defaults>
</compile_context>

<pallas_src>
import functools
import math

import jax
import jax.numpy as jnp
from jax import lax
from jax.experimental import pallas as pl
from jax.experimental.pallas import tpu as pltpu


def _round_up(x, n):
    return ((x + n - 1) // n) * n


def _pick_tile(b_pad, preferences):
    for t in preferences:
        if t <= b_pad and b_pad % t == 0:
            return t
    return b_pad


def _supcr_tile_kernel(t_row_ref, t_col_ref, row_ref, col_ref, out_ref, *,
                       margin, batch, tm, tn, log_eps, signed):
    """One (tm, tn) tile of the b_pad x b_pad pair matrix.

    Accumulates a per-row-block (8, tn) partial directly into the resident
    output block; the wrapper reduces it to a scalar.
    """
    i = pl.program_id(0)
    j = pl.program_id(1)

    # Reset the resident accumulator block at the start of each row block.
    @pl.when(j == 0)
    def _():
        out_ref[...] = jnp.zeros_like(out_ref)

    # MXU Gram tile: rows are pre-normalized and pre-scaled by 1/T, columns
    # pre-normalized, so z == sim / T directly.  f32 accumulation.
    prec = lax.Precision.HIGHEST if row_ref.dtype == jnp.float32 else None
    z = lax.dot_general(row_ref[...], col_ref[...],
                        dimension_numbers=(((1,), (1,)), ((), ())),
                        preferred_element_type=jnp.float32,
                        precision=prec)
    log_term = jnp.log(jnp.exp(z) + 1e-6)           # one exp + one log per pair

    if signed:
        # m falsy: off-diagonal pairs are exclusively positive OR negative
        # (margin >= 0); they contribute sign * (L - log(1+1e-6)).
        t_d = jnp.abs(t_row_ref[...] - t_col_ref[...]) - margin      # (tm, tn)
        val = jnp.where(t_d > 0.0, log_term - log_eps, log_eps - log_term)
    else:
        # m truthy: every off-diagonal real pair contributes +L; constant
        # terms are folded back in the wrapper.
        val = log_term

    row0 = i * tm
    col0 = j * tn
    touches_diag = (row0 < col0 + tn) & (col0 < row0 + tm)
    touches_pad = (row0 + tm > batch) | (col0 + tn > batch)
    needs_mask = touches_diag | touches_pad

    def _accumulate(x):
        # (tm, tn) -> (8, tn) with pure vreg adds (no cross-lane reduce, no
        # SMEM round trip); final reduction happens in the wrapper.
        part = x[0:8, :]
        for r in range(1, tm // 8):
            part = part + x[r * 8:(r + 1) * 8, :]
        out_ref[...] += part

    # Cold path: only tiles intersecting the diagonal or the padded tail.
    @pl.when(needs_mask)
    def _():
        rg = row0 + lax.broadcasted_iota(jnp.int32, (tm, tn), 0)
        cg = col0 + lax.broadcasted_iota(jnp.int32, (tm, tn), 1)
        live = (rg < batch) & (cg < batch) & (rg != cg)
        _accumulate(jnp.where(live, val, 0.0))

    # Hot path: interior, fully-real, off-diagonal tiles — no masks, no iotas.
    @pl.when(jnp.logical_not(needs_mask))
    def _():
        _accumulate(val)


def supcr_loss(embeddings, targets, *, margin=1.0, temperature=0.07, m=None,
               use_bf16_matmul=True):
    """Pallas TPU implementation of SupCRLoss.forward.

    embeddings: (B, D) float array
    targets:    (B,)   float array
    m: mirrors PyTorch truthiness (`if self.m:`): m=None or m=0.0 selects the
       `lp + ln` branch.
    use_bf16_matmul: bf16 MXU operands (f32 accumulation); ~1e-2-level accuracy
       on the loss.  Set False for f32-tight results.
    returns: scalar float32 loss
    """
    if margin < 0.0:
        raise ValueError("supcr_loss assumes margin >= 0 (the fused pos/neg "
                         "pair classification relies on it).")
    B, D = embeddings.shape
    b_pad = _round_up(B, 128)
    d_pad = _round_up(D, 128)

    # --- tile selection ------------------------------------------------------
    tm = _pick_tile(b_pad, (512, 384, 256, 128))   # row panel (resident per i)
    tn = _pick_tile(b_pad, (256, 128))             # col panel (streamed over j)
    if b_pad // tm == 1 and b_pad >= 256:
        tm = b_pad // 2     # gi >= 2 so v7x's two TensorCores both get rows

    itemsize = 2 if use_bf16_matmul else 4

    def _vmem_bytes(tm_, tn_):
        return (2 * tm_ * d_pad * itemsize      # row panel  (double-buffered)
                + 2 * tn_ * d_pad * itemsize    # col panel  (double-buffered)
                + 2 * (tm_ + tn_) * 4           # target blocks
                + 2 * 8 * tn_ * 4)              # resident output block

    # Keep the working set comfortably inside v7x's 64 MiB VMEM.
    while _vmem_bytes(tm, tn) > 40 * 1024 * 1024 and tm >= 256:
        tm //= 2
    while _vmem_bytes(tm, tn) > 40 * 1024 * 1024 and tn >= 256:
        tn //= 2
    # TODO(synk): for very large D (d_pad >~ 4K on v7x) add a k grid axis over
    # D chunks with an f32 (tm, tn) similarity accumulator instead of shrinking
    # the row/col tiles.

    gi, gj = b_pad // tm, b_pad // tn

    # --- hoisted prep: L2 normalization + 1/T folded into the row operand ----
    emb = embeddings.astype(jnp.float32)
    norm = jnp.sqrt(jnp.sum(emb * emb, axis=1, keepdims=True))
    emb_n = emb / jnp.maximum(norm, 1e-12)               # F.normalize, eps=1e-12
    emb_n = jnp.pad(emb_n, ((0, b_pad - B), (0, d_pad - D)))
    mm_dtype = jnp.bfloat16 if use_bf16_matmul else jnp.float32
    rows = (emb_n * (1.0 / float(temperature))).astype(mm_dtype)
    cols = emb_n.astype(mm_dtype)

    tgt = jnp.pad(targets.astype(jnp.float32), (0, b_pad - B))
    t_row = tgt.reshape(b_pad, 1)
    t_col = tgt.reshape(1, b_pad)

    signed = not m                      # mirror PyTorch `if self.m:` truthiness
    log_eps = float(math.log1p(1e-6))   # log(exp(0) + 1e-6)

    kernel = functools.partial(
        _supcr_tile_kernel, margin=float(margin), batch=B, tm=tm, tn=tn,
        log_eps=log_eps, signed=signed)

    vmem_limit = int(min(100 * 1024 * 1024,
                         max(32 * 1024 * 1024, 2 * _vmem_bytes(tm, tn))))

    partial = pl.pallas_call(
        kernel,
        out_shape=jax.ShapeDtypeStruct((gi * 8, tn), jnp.float32),
        grid_spec=pltpu.PrefetchScalarGridSpec(
            num_scalar_prefetch=0,
            grid=(gi, gj),
            in_specs=[
                pl.BlockSpec((tm, 1), lambda i, j: (i, 0)),       # row targets
                pl.BlockSpec((1, tn), lambda i, j: (0, j)),       # col targets
                pl.BlockSpec((tm, d_pad), lambda i, j: (i, 0)),   # row emb panel
                pl.BlockSpec((tn, d_pad), lambda i, j: (j, 0)),   # col emb panel
            ],
            out_specs=pl.BlockSpec((8, tn), lambda i, j: (i, 0)),
        ),
        compiler_params=pltpu.CompilerParams(
            dimension_semantics=("parallel", "arbitrary"),
            vmem_limit_bytes=vmem_limit),
        cost_estimate=pl.CostEstimate(
            flops=int(2 * b_pad * b_pad * d_pad),
            transcendentals=int(2 * b_pad * b_pad),
            bytes_accessed=int((1 + gi) * b_pad * d_pad * itemsize
                               + (gi + gj) * b_pad * 4 + gi * 8 * tn * 4)),
    )(t_row, t_col, rows, cols)

    total = jnp.sum(partial)
    denom = float(B * B)
    if m:
        # loss = m + sum_offdiag_real(L)/B^2 + (B^2 + B)/B^2 * log(1+1e-6)
        return m + total / denom + (denom + B) / denom * log_eps
    # loss = mean( sign * (L - log(1+1e-6)) ), sign=+1 neg pairs, -1 pos pairs
    return total / denom


def _supcr_loss_ref(embeddings, targets, *, margin=1.0, temperature=0.07, m=None):
    """Pure-JAX reference mirroring the PyTorch forward exactly."""
    emb = embeddings.astype(jnp.float32)
    t = targets.astype(jnp.float32)
    norm = jnp.sqrt(jnp.sum(emb * emb, axis=1, keepdims=True))
    emb = emb / jnp.maximum(norm, 1e-12)
    sim = jnp.matmul(emb, emb.T, precision=lax.Precision.HIGHEST)
    diffs = jnp.maximum(jnp.abs(t[:, None] - t[None, :]) - margin, 0.0)
    pos = (diffs == 0.0).astype(jnp.float32) - jnp.eye(t.shape[0], dtype=jnp.float32)
    neg = (diffs > 0.0).astype(jnp.float32)
    lp = -jnp.mean(jnp.log(jnp.exp(sim * pos / temperature) + 1e-6))
    ln = jnp.mean(jnp.log(jnp.exp(sim * neg / temperature) + 1e-6))
    return (m - lp + ln) if m else (lp + ln)


if __name__ == "__main__":
    key = jax.random.PRNGKey(0)
    cases = [
        dict(B=8, D=32, margin=1.0, temperature=0.07, m=None),    # single tile
        dict(B=8, D=32, margin=1.0, temperature=0.07, m=2.0),     # m-branch
        dict(B=300, D=72, margin=0.5, temperature=0.1, m=None),   # padded, 2x3 grid
        dict(B=512, D=64, margin=0.5, temperature=0.1, m=3.0),    # unpadded, hot path
    ]
    for idx, case in enumerate(cases):
        k_emb, k_tgt = jax.random.split(jax.random.fold_in(key, idx))
        B, D = case["B"], case["D"]
        embeddings = jax.random.normal(k_emb, (B, D), dtype=jnp.float32)
        targets = jax.random.uniform(k_tgt, (B,), dtype=jnp.float32,
                                     minval=0.0, maxval=3.0)

        ref = _supcr_loss_ref(embeddings, targets, margin=case["margin"],
                              temperature=case["temperature"], m=case["m"])

        # f32 MXU operands: tight tolerance against the reference.
        loss_f32 = supcr_loss(embeddings, targets, margin=case["margin"],
                              temperature=case["temperature"], m=case["m"],
                              use_bf16_matmul=False)
        loss_f32 = jax.block_until_ready(loss_f32)
        assert jnp.allclose(loss_f32, ref, rtol=1e-4, atol=1e-4), \
            ("f32", idx, float(loss_f32), float(ref))

        # bf16 MXU operands (default fast path): bf16-level tolerance.
        loss_bf16 = supcr_loss(embeddings, targets, margin=case["margin"],
                               temperature=case["temperature"], m=case["m"])
        loss_bf16 = jax.block_until_ready(loss_bf16)
        assert jnp.allclose(loss_bf16, ref, rtol=5e-2, atol=5e-2), \
            ("bf16", idx, float(loss_bf16), float(ref))

    print("KERNEL_OK")
</pallas_src>

<mosaic_0001>
module attributes {stable_mosaic.version = 11 : i64} {
  func.func @_supcr_tile_kernel(%arg0: i32, %arg1: i32, %arg2: memref<128x1xf32, #tpu.memory_space<vmem>>, %arg3: memref<1x128xf32, #tpu.memory_space<vmem>>, %arg4: memref<128x128xf32, #tpu.memory_space<vmem>>, %arg5: memref<128x128xf32, #tpu.memory_space<vmem>>, %arg6: memref<8x128xf32, #tpu.memory_space<vmem>>) attributes {dimension_semantics = [#tpu.dimension_semantics<parallel>, #tpu.dimension_semantics<arbitrary>], iteration_bounds = array<i64: 1, 1>, scalar_prefetch = 0 : i64, scratch_operands = 0 : i64, tpu.core_type = #tpu.core_type<tc>, window_params = [{transform_indices = @transform_0, window_bounds = array<i64: 128, 1>}, {transform_indices = @transform_1, window_bounds = array<i64: 1, 128>}, {transform_indices = @transform_2, window_bounds = array<i64: 128, 128>}, {transform_indices = @transform_3, window_bounds = array<i64: 128, 128>}, {transform_indices = @transform_4, window_bounds = array<i64: 8, 128>}]} {
    %c0_i32 = arith.constant 0 : i32
    %0 = arith.cmpi eq, %arg1, %c0_i32 : i32
    %1 = arith.extui %0 : i1 to i32
    %c0_i32_0 = arith.constant 0 : i32
    %2 = arith.cmpi ne, %1, %c0_i32_0 : i32
    scf.if %2 {
      %cst_21 = arith.constant 0.000000e+00 : f32
      %43 = vector.broadcast %cst_21 : f32 to vector<8x128xf32>
      %c0_22 = arith.constant 0 : index
      %c0_23 = arith.constant 0 : index
      %44 = vector.load %arg6[%c0_22, %c0_23] : memref<8x128xf32, #tpu.memory_space<vmem>>, vector<8x128xf32>
      tpu.vector_store %arg6[%c0_22, %c0_23], %43 {strides = array<i32>} : memref<8x128xf32, #tpu.memory_space<vmem>>, vector<8x128xf32>,
    } else {
    }
    %c0 = arith.constant 0 : index
    %c0_1 = arith.constant 0 : index
    %3 = vector.load %arg4[%c0, %c0_1] : memref<128x128xf32, #tpu.memory_space<vmem>>, vector<128x128xf32>
    %c0_2 = arith.constant 0 : index
    %c0_3 = arith.constant 0 : index
    %4 = vector.load %arg5[%c0_2, %c0_3] : memref<128x128xf32, #tpu.memory_space<vmem>>, vector<128x128xf32>
    %cst = arith.constant dense<0.000000e+00> : vector<128x128xf32>
    %5 = tpu.matmul %3, %4, %cst {dimension_numbers = #tpu.dot_dimension_numbers<[1], [1], [0], [0], [0, 0, 1, 0], [], []>, precision = #tpu.contract_precision<fp32>} : vector<128x128xf32>, vector<128x128xf32>, vector<128x128xf32> -> vector<128x128xf32>
    %6 = math.exp %5 : vector<128x128xf32>
    %cst_4 = arith.constant 9.99999997E-7 : f32
    %7 = vector.broadcast %cst_4 : f32 to vector<128x128xf32>
    %8 = arith.addf %6, %7 : vector<128x128xf32>
    %9 = math.log %8 : vector<128x128xf32>
    %c0_5 = arith.constant 0 : index
    %c0_6 = arith.constant 0 : index
    %10 = vector.load %arg2[%c0_5, %c0_6] : memref<128x1xf32, #tpu.memory_space<vmem>>, vector<128x1xf32>
    %c0_7 = arith.constant 0 : index
    %c0_8 = arith.constant 0 : index
    %11 = vector.load %arg3[%c0_7, %c0_8] : memref<1x128xf32, #tpu.memory_space<vmem>>, vector<1x128xf32>
    %12 = vector.broadcast %10 : vector<128x1xf32> to vector<128x128xf32>
    %13 = vector.broadcast %11 : vector<1x128xf32> to vector<128x128xf32>
    %14 = arith.subf %12, %13 : vector<128x128xf32>
    %15 = math.absf %14 : vector<128x128xf32>
    %cst_9 = arith.constant 1.000000e+00 : f32
    %16 = vector.broadcast %cst_9 : f32 to vector<128x128xf32>
    %17 = arith.subf %15, %16 : vector<128x128xf32>
    %cst_10 = arith.constant 0.000000e+00 : f32
    %18 = vector.broadcast %cst_10 : f32 to vector<128x128xf32>
    %19 = arith.cmpf ogt, %17, %18 : vector<128x128xf32>
    %cst_11 = arith.constant 9.99999543E-7 : f32
    %20 = vector.broadcast %cst_11 : f32 to vector<128x128xf32>
    %21 = arith.subf %9, %20 : vector<128x128xf32>
    %cst_12 = arith.constant 9.99999543E-7 : f32
    %22 = vector.broadcast %cst_12 : f32 to vector<128x128xf32>
    %23 = arith.subf %22, %9 : vector<128x128xf32>
    %24 = arith.select %19, %21, %23 : vector<128x128xi1>, vector<128x128xf32>
    %c128_i32 = arith.constant 128 : i32
    %25 = arith.muli %arg0, %c128_i32 : i32
    %c128_i32_13 = arith.constant 128 : i32
    %26 = arith.muli %arg1, %c128_i32_13 : i32
    %c128_i32_14 = arith.constant 128 : i32
    %27 = arith.addi %26, %c128_i32_14 : i32
    %28 = arith.cmpi slt, %25, %27 : i32
    %c128_i32_15 = arith.constant 128 : i32
    %29 = arith.addi %25, %c128_i32_15 : i32
    %30 = arith.cmpi slt, %26, %29 : i32
    %31 = arith.andi %28, %30 : i1
    %c128_i32_16 = arith.constant 128 : i32
    %32 = arith.addi %25, %c128_i32_16 : i32
    %c8_i32 = arith.constant 8 : i32
    %33 = arith.cmpi sgt, %32, %c8_i32 : i32
    %c128_i32_17 = arith.constant 128 : i32
    %34 = arith.addi %26, %c128_i32_17 : i32
    %c8_i32_18 = arith.constant 8 : i32
    %35 = arith.cmpi sgt, %34, %c8_i32_18 : i32
    %36 = arith.ori %33, %35 : i1
    %37 = arith.ori %31, %36 : i1
    %38 = arith.extui %37 : i1 to i32
    %c0_i32_19 = arith.constant 0 : i32
    %39 = arith.cmpi ne, %38, %c0_i32_19 : i32
    scf.if %39 {
      %43 = tpu.iota {dimensions = array<i32: 0>} : vector<128x128xi32>
      %44 = vector.broadcast %25 : i32 to vector<128x128xi32>
      %45 = arith.addi %44, %43 : vector<128x128xi32>
      %46 = tpu.iota {dimensions = array<i32: 1>} : vector<128x128xi32>
      %47 = vector.broadcast %26 : i32 to vector<128x128xi32>
      %48 = arith.addi %47, %46 : vector<128x128xi32>
      %c8_i32_21 = arith.constant 8 : i32
      %49 = vector.broadcast %c8_i32_21 : i32 to vector<128x128xi32>
      %50 = arith.cmpi slt, %45, %49 : vector<128x128xi32>
      %c8_i32_22 = arith.constant 8 : i32
      %51 = vector.broadcast %c8_i32_22 : i32 to vector<128x128xi32>
      %52 = arith.cmpi slt, %48, %51 : vector<128x128xi32>
      %53 = arith.andi %50, %52 : vector<128x128xi1>
      %54 = arith.cmpi ne, %45, %48 : vector<128x128xi32>
      %55 = arith.andi %53, %54 : vector<128x128xi1>
      %cst_23 = arith.constant 0.000000e+00 : f32
      %56 = vector.broadcast %cst_23 : f32 to vector<128x128xf32>
      %57 = arith.select %55, %24, %56 : vector<128x128xi1>, vector<128x128xf32>
      %58 = vector.extract_strided_slice %57 {offsets = [0, 0], sizes = [8, 128], strides = [1, 1]} : vector<128x128xf32> to vector<8x128xf32>
      %59 = vector.extract_strided_slice %57 {offsets = [8, 0], sizes = [8, 128], strides = [1, 1]} : vector<128x128xf32> to vector<8x128xf32>
      %60 = arith.addf %58, %59 : vector<8x128xf32>
      %61 = vector.extract_strided_slice %57 {offsets = [16, 0], sizes = [8, 128], strides = [1, 1]} : vector<128x128xf32> to vector<8x128xf32>
      %62 = arith.addf %60, %61 : vector<8x128xf32>
      %63 = vector.extract_strided_slice %57 {offsets = [24, 0], sizes = [8, 128], strides = [1, 1]} : vector<128x128xf32> to vector<8x128xf32>
      %64 = arith.addf %62, %63 : vector<8x128xf32>
      %65 = vector.extract_strided_slice %57 {offsets = [32, 0], sizes = [8, 128], strides = [1, 1]} : vector<128x128xf32> to vector<8x128xf32>
      %66 = arith.addf %64, %65 : vector<8x128xf32>
      %67 = vector.extract_strided_slice %57 {offsets = [40, 0], sizes = [8, 128], strides = [1, 1]} : vector<128x128xf32> to vector<8x128xf32>
      %68 = arith.addf %66, %67 : vector<8x128xf32>
      %69 = vector.extract_strided_slice %57 {offsets = [48, 0], sizes = [8, 128], strides = [1, 1]} : vector<128x128xf32> to vector<8x128xf32>
      %70 = arith.addf %68, %69 : vector<8x128xf32>
      %71 = vector.extract_strided_slice %57 {offsets = [56, 0], sizes = [8, 128], strides = [1, 1]} : vector<128x128xf32> to vector<8x128xf32>
      %72 = arith.addf %70, %71 : vector<8x128xf32>
      %73 = vector.extract_strided_slice %57 {offsets = [64, 0], sizes = [8, 128], strides = [1, 1]} : vector<128x128xf32> to vector<8x128xf32>
      %74 = arith.addf %72, %73 : vector<8x128xf32>
      %75 = vector.extract_strided_slice %57 {offsets = [72, 0], sizes = [8, 128], strides = [1, 1]} : vector<128x128xf32> to vector<8x128xf32>
      %76 = arith.addf %74, %75 : vector<8x128xf32>
      %77 = vector.extract_strided_slice %57 {offsets = [80, 0], sizes = [8, 128], strides = [1, 1]} : vector<128x128xf32> to vector<8x128xf32>
      %78 = arith.addf %76, %77 : vector<8x128xf32>
      %79 = vector.extract_strided_slice %57 {offsets = [88, 0], sizes = [8, 128], strides = [1, 1]} : vector<128x128xf32> to vector<8x128xf32>
      %80 = arith.addf %78, %79 : vector<8x128xf32>
      %81 = vector.extract_strided_slice %57 {offsets = [96, 0], sizes = [8, 128], strides = [1, 1]} : vector<128x128xf32> to vector<8x128xf32>
      %82 = arith.addf %80, %81 : vector<8x128xf32>
      %83 = vector.extract_strided_slice %57 {offsets = [104, 0], sizes = [8, 128], strides = [1, 1]} : vector<128x128xf32> to vector<8x128xf32>
      %84 = arith.addf %82, %83 : vector<8x128xf32>
      %85 = vector.extract_strided_slice %57 {offsets = [112, 0], sizes = [8, 128], strides = [1, 1]} : vector<128x128xf32> to vector<8x128xf32>
      %86 = arith.addf %84, %85 : vector<8x128xf32>
      %87 = vector.extract_strided_slice %57 {offsets = [120, 0], sizes = [8, 128], strides = [1, 1]} : vector<128x128xf32> to vector<8x128xf32>
      %88 = arith.addf %86, %87 : vector<8x128xf32>
      %c0_24 = arith.constant 0 : index
      %c0_25 = arith.constant 0 : index
      %89 = vector.load %arg6[%c0_24, %c0_25] : memref<8x128xf32, #tpu.memory_space<vmem>>, vector<8x128xf32>
      %90 = arith.addf %89, %88 : vector<8x128xf32>
      %c0_26 = arith.constant 0 : index
      %c0_27 = arith.constant 0 : index
      %91 = vector.load %arg6[%c0_26, %c0_27] : memref<8x128xf32, #tpu.memory_space<vmem>>, vector<8x128xf32>
      tpu.vector_store %arg6[%c0_26, %c0_27], %90 {strides = array<i32>} : memref<8x128xf32, #tpu.memory_space<vmem>>, vector<8x128xf32>,
    } else {
    }
    %true = arith.constant true
    %40 = arith.xori %37, %true : i1
    %41 = arith.extui %40 : i1 to i32
    %c0_i32_20 = arith.constant 0 : i32
    %42 = arith.cmpi ne, %41, %c0_i32_20 : i32
    scf.if %42 {
      %43 = vector.extract_strided_slice %24 {offsets = [0, 0], sizes = [8, 128], strides = [1, 1]} : vector<128x128xf32> to vector<8x128xf32>
      %44 = vector.extract_strided_slice %24 {offsets = [8, 0], sizes = [8, 128], strides = [1, 1]} : vector<128x128xf32> to vector<8x128xf32>
      %45 = arith.addf %43, %44 : vector<8x128xf32>
      %46 = vector.extract_strided_slice %24 {offsets = [16, 0], sizes = [8, 128], strides = [1, 1]} : vector<128x128xf32> to vector<8x128xf32>
      %47 = arith.addf %45, %46 : vector<8x128xf32>
      %48 = vector.extract_strided_slice %24 {offsets = [24, 0], sizes = [8, 128], strides = [1, 1]} : vector<128x128xf32> to vector<8x128xf32>
      %49 = arith.addf %47, %48 : vector<8x128xf32>
      %50 = vector.extract_strided_slice %24 {offsets = [32, 0], sizes = [8, 128], strides = [1, 1]} : vector<128x128xf32> to vector<8x128xf32>
      %51 = arith.addf %49, %50 : vector<8x128xf32>
      %52 = vector.extract_strided_slice %24 {offsets = [40, 0], sizes = [8, 128], strides = [1, 1]} : vector<128x128xf32> to vector<8x128xf32>
      %53 = arith.addf %51, %52 : vector<8x128xf32>
      %54 = vector.extract_strided_slice %24 {offsets = [48, 0], sizes = [8, 128], strides = [1, 1]} : vector<128x128xf32> to vector<8x128xf32>
      %55 = arith.addf %53, %54 : vector<8x128xf32>
      %56 = vector.extract_strided_slice %24 {offsets = [56, 0], sizes = [8, 128], strides = [1, 1]} : vector<128x128xf32> to vector<8x128xf32>
      %57 = arith.addf %55, %56 : vector<8x128xf32>
      %58 = vector.extract_strided_slice %24 {offsets = [64, 0], sizes = [8, 128], strides = [1, 1]} : vector<128x128xf32> to vector<8x128xf32>
      %59 = arith.addf %57, %58 : vector<8x128xf32>
      %60 = vector.extract_strided_slice %24 {offsets = [72, 0], sizes = [8, 128], strides = [1, 1]} : vector<128x128xf32> to vector<8x128xf32>
      %61 = arith.addf %59, %60 : vector<8x128xf32>
      %62 = vector.extract_strided_slice %24 {offsets = [80, 0], sizes = [8, 128], strides = [1, 1]} : vector<128x128xf32> to vector<8x128xf32>
      %63 = arith.addf %61, %62 : vector<8x128xf32>
      %64 = vector.extract_strided_slice %24 {offsets = [88, 0], sizes = [8, 128], strides = [1, 1]} : vector<128x128xf32> to vector<8x128xf32>
      %65 = arith.addf %63, %64 : vector<8x128xf32>
      %66 = vector.extract_strided_slice %24 {offsets = [96, 0], sizes = [8, 128], strides = [1, 1]} : vector<128x128xf32> to vector<8x128xf32>
      %67 = arith.addf %65, %66 : vector<8x128xf32>
      %68 = vector.extract_strided_slice %24 {offsets = [104, 0], sizes = [8, 128], strides = [1, 1]} : vector<128x128xf32> to vector<8x128xf32>
      %69 = arith.addf %67, %68 : vector<8x128xf32>
      %70 = vector.extract_strided_slice %24 {offsets = [112, 0], sizes = [8, 128], strides = [1, 1]} : vector<128x128xf32> to vector<8x128xf32>
      %71 = arith.addf %69, %70 : vector<8x128xf32>
      %72 = vector.extract_strided_slice %24 {offsets = [120, 0], sizes = [8, 128], strides = [1, 1]} : vector<128x128xf32> to vector<8x128xf32>
      %73 = arith.addf %71, %72 : vector<8x128xf32>
      %c0_21 = arith.constant 0 : index
      %c0_22 = arith.constant 0 : index
      %74 = vector.load %arg6[%c0_21, %c0_22] : memref<8x128xf32, #tpu.memory_space<vmem>>, vector<8x128xf32>
      %75 = arith.addf %74, %73 : vector<8x128xf32>
      %c0_23 = arith.constant 0 : index
      %c0_24 = arith.constant 0 : index
      %76 = vector.load %arg6[%c0_23, %c0_24] : memref<8x128xf32, #tpu.memory_space<vmem>>, vector<8x128xf32>
      tpu.vector_store %arg6[%c0_23, %c0_24], %75 {strides = array<i32>} : memref<8x128xf32, #tpu.memory_space<vmem>>, vector<8x128xf32>,
    } else {
    }
    return
  }
  func.func @transform_0(%arg0: i32, %arg1: i32) -> (i32, i32) {
    %c0_i32 = arith.constant 0 : i32
    %c0_i32_0 = arith.constant 0 : i32
    return %arg0, %c0_i32 : i32, i32
  }
  func.func @transform_1(%arg0: i32, %arg1: i32) -> (i32, i32) {
    %c0_i32 = arith.constant 0 : i32
    %c0_i32_0 = arith.constant 0 : i32
    return %c0_i32, %arg1 : i32, i32
  }
  func.func @transform_2(%arg0: i32, %arg1: i32) -> (i32, i32) {
    %c0_i32 = arith.constant 0 : i32
    %c0_i32_0 = arith.constant 0 : i32
    return %arg0, %c0_i32 : i32, i32
  }
  func.func @transform_3(%arg0: i32, %arg1: i32) -> (i32, i32) {
    %c0_i32 = arith.constant 0 : i32
    %c0_i32_0 = arith.constant 0 : i32
    return %arg1, %c0_i32 : i32, i32
  }
  func.func @transform_4(%arg0: i32, %arg1: i32) -> (i32, i32) {
    %c0_i32 = arith.constant 0 : i32
    %c0_i32_0 = arith.constant 0 : i32
    return %arg0, %c0_i32 : i32, i32
  }
}

</mosaic_0001>

<bundles_post_ra>
// kernel: tpu_custom_call.1
= control target key start
LH: loop header
LB: loop body
LE: loop exit
PB: predicated region body
PF: predicated region fallthrough
CT: control target
= control target key end

     0   :  { %9 = vsyncpa [#allocation3], 0  ;;  %s3104_s0 = inlined_call_operand.vmem [shape: f32[128,1], index: 0, kind: input, shape index: {}]   ;;  %s3105_s1 = inlined_call_operand.vmem [shape: f32[1,128], index: 1, kind: input, shape index: {}]   ;;  %s3106_s2 = inlined_call_operand.vmem [shape: f32[128,128], index: 2, kind: input, shape index: {}]   ;;  %s3107_s3 = inlined_call_operand.hbm [shape: f32[128,128], index: 3, kind: input, shape index: {}]   ;;  %s3108_s4 = inlined_call_operand.hbm [shape: f32[8,128], index: 4, kind: output, shape index: {}]  }
   0x1   :  { %10 = vsyncpa [#allocation4], 0  ;;  %s2454_s15 = smov [#allocation2]  }
   0x2   :  { %s22_s16 = sshll.u32 %s2454_s15, 4  ;;  %s23_s16 = int_to_ptr.vmem [resolvable:$true] %s22_s16 }
   0x3   :  { %s2418_s17 = scalar_lea.vmem %s23_s16, 2048  ;;  %p2423_p1 = scmp.lt.s32.totalorder %s23_s16, %s23_s16 }
   0x4   :  { %p2419_p0 = scmp.ne.s32.totalorder %s23_s16, %s2418_s17  ;;  %p2424_p2 = scmp.lt.s32.totalorder %s2418_s17, %s2418_s17 }
   0x6   :  { %p2425_p3 = por %p2424_p2, %p2423_p1 }
   0x8   :  { %p2426_p4 = pnand %p2425_p3, %p2419_p0 }
   0xa   :  { %2429 = shalt.err (!%p2426_p4)
}
   0xb   :  { %s2455_s18 = smov 128   ;;  %s2456_s19 = smov 8  }
   0xc   :  { %28 = dma.hbm_to_vmem [thread:$0]  %s3107_s3, 2048, %s23_s16, [#allocation3], %s2455_s18, %s2455_s18, %s2456_s19  }
   0xd   :  { %2450 = dma.done.wait [#allocation3], 2048  }
   0xe   :  { %2451 = vsyncadd [#allocation3], 4294965248  ;;  %v68_v0 = vld [vmem:[#allocation2 + $0x78] sm:$0xff]  ;;  %v67_v1 = vld [vmem:[#allocation2 + $0x70] sm:$0xff] }
   0xf   :  { %v66_v2 = vld [vmem:[#allocation2 + $0x68] sm:$0xff]  ;;  %v2487_v3 = vand.u32 4294901760, %v68_v0  ;;  %v2489_v4 = vand.u32 4294901760, %v67_v1  ;;  %v65_v6 = vld [vmem:[#allocation2 + $0x60] sm:$0xff]  ;;  %v64_v7 = vld [vmem:[#allocation2 + $0x58] sm:$0xff] }
  0x10   :  { %v2491_v5 = vand.u32 4294901760, %v66_v2  ;;  %v2493_v8 = vand.u32 4294901760, %v65_v6  ;;  %v2506_v12 = vand.u32 4294901760, %v64_v7  ;;  %v63_v16 = vld [vmem:[#allocation2 + $0x50] sm:$0xff]  ;;  %v62_v26 = vld [vmem:[#allocation2 + $0x48] sm:$0xff]  ;;  %v61_v31 = vld [vmem:[#allocation2 + $0x40] sm:$0xff] }
  0x11   :  { %2063 = vmatprep.subr.mxu0 %v2487_v3  ;;  %v2497_v9 = vsub.f32 %v68_v0, %v2487_v3  ;;  %v2500_v10 = vsub.f32 %v67_v1, %v2489_v4  ;;  %v2526_v20 = vand.u32 4294901760, %v63_v16  ;;  %v2538_v27 = vand.u32 4294901760, %v62_v26  ;;  %v37_v33 = vld [vmem:[%s3106_s2] sm:$0xff]  ;;  %v60_v39 = vld [vmem:[#allocation2 + $0x38] sm:$0xff]  ;;  %v59_v47 = vld [vmem:[#allocation2 + $0x30] sm:$0xff] }
  0x12   :  { %v2503_v11 = vsub.f32 %v66_v2, %v2491_v5  ;;  %2064 = vmatpush3.xpose.msra.mxu0 %v2487_v3  ;;  %v2519_v17 = vsub.f32 %v65_v6, %v2493_v8  ;;  %v2529_v21 = vsub.f32 %v64_v7, %v2506_v12  ;;  %v2553_v34 = vand.u32 4294901760, %v61_v31  ;;  %v58_v55 = vld [vmem:[#allocation2 + $0x28] sm:$0xff]  ;;  %v57_v61 = vld [vmem:[#allocation2 + $0x20] sm:$0xff]  ;;  %v56_v6 = vld [vmem:[#allocation2 + $0x18] sm:$0xff] }
  0x13   :  { %2065 = vmatprep.subr.mxu0 %v2489_v4  ;;  %v2510_v13 = vand.u32 4294901760, %v2497_v9  ;;  %v2513_v14 = vand.u32 4294901760, %v2500_v10  ;;  %v2547_v32 = vsub.f32 %v63_v16, %v2526_v20  ;;  %v2555_v35 = vand.u32 4294901760, %v37_v33 }
  0x14   :  { %v2516_v15 = vand.u32 4294901760, %v2503_v11  ;;  %v2535_v25 = vand.u32 4294901760, %v2519_v17  ;;  %v2544_v30 = vand.u32 4294901760, %v2529_v21  ;;  %v2564_v40 = vsub.f32 %v62_v26, %v2538_v27 }
  0x15   :  { %3163 = vst [vmem:[#allocation8_spill] sm:$0xff] %v2510_v13  ;;  %3164 = vst [vmem:[#allocation9_spill] sm:$0xff] %v2513_v14  ;;  %v314_v18 = vsub.f32 %v2497_v9, %v2510_v13  ;;  %v321_v19 = vsub.f32 %v2500_v10, %v2513_v14  ;;  %v2561_v38 = vand.u32 4294901760, %v2547_v32  ;;  %v2567_v41 = vsub.f32 %v37_v33, %v2555_v35  ;;  %v54_v33 = vld [vmem:[#allocation2 + $0x8] sm:$0xff] }
  0x16   :  { %3165 = vst [vmem:[#allocation10_spill] sm:$0xff] %v2516_v15  ;;  %2066 = vmatpush3.xpose.msra.mxu0 %v2489_v4  ;;  %v328_v24 = vsub.f32 %v2503_v11, %v2516_v15  ;;  %3166 = vst [vmem:[#allocation11_spill] sm:$0xff] %v2535_v25  ;;  %v335_v29 = vsub.f32 %v2519_v17, %v2535_v25  ;;  %v342_v37 = vsub.f32 %v2529_v21, %v2544_v30 }
  0x17   :  { %2067 = vmatprep.subr.mxu0 %v2491_v5  ;;  %v315_v22 = vand.u32 4294901760, %v314_v18  ;;  %v322_v23 = vand.u32 4294901760, %v321_v19  ;;  %3167 = vst [vmem:[#allocation12_spill] sm:$0xff] %v2544_v30  ;;  %3168 = vst [vmem:[#allocation13_spill] sm:$0xff] %v2555_v35  ;;  %2151 = vmatprep.mubr.f32.mxu1 %v2555_v35  ;;  %v2571_v42 = vand.u32 4294901760, %v60_v39  ;;  %v3109_v43 = vand.u32 4294901760, %v2567_v41 }
  0x18   :  { %v329_v28 = vand.u32 4294901760, %v328_v24  ;;  %v336_v36 = vand.u32 4294901760, %v335_v29  ;;  %3169 = vst [vmem:[#allocation14_spill] sm:$0xff] %v2561_v38  ;;  %v343_v44 = vand.u32 4294901760, %v342_v37  ;;  %v349_v45 = vsub.f32 %v2547_v32, %v2561_v38 }
  0x19   :  { %2119 = vmatprep.subr.mxu1 %v315_v22  ;;  %v2578_v46 = vand.u32 4294901760, %v2564_v40  ;;  %v2581_v48 = vsub.f32 %v61_v31, %v2553_v34  ;;  %v153_v49 = vsub.f32 %v2567_v41, %v3109_v43  ;;  %v2587_v50 = vand.u32 4294901760, %v59_v47 }
  0x1a   :  { %2068 = vmatpush3.xpose.msra.mxu0 %v2491_v5  ;;  %2120 = vmatpush3.xpose.msra.mxu1 %v315_v22  ;;  %v350_v52 = vand.u32 4294901760, %v349_v45  ;;  %v2596_v56 = vsub.f32 %v60_v39, %v2571_v42  ;;  %v2599_v57 = vand.u32 4294901760, %v58_v55  ;;  %v2611_v63 = vand.u32 4294901760, %v57_v61  ;;  %v38_v39 = vld [vmem:[%s3106_s2 + $0x8] sm:$0xff] }
  0x1b   :  { %2069 = vmatprep.subr.mxu0 %v2493_v8  ;;  %2121 = vmatprep.subr.mxu1 %v322_v23  ;;  %3170 = vst [vmem:[#allocation15_spill] sm:$0xff] %v2578_v46  ;;  %v154_v51 = vand.u32 4294901760, %v153_v49  ;;  %v356_v53 = vsub.f32 %v2564_v40, %v2578_v46  ;;  %v2593_v54 = vand.u32 4294901760, %v2581_v48  ;;  %v2608_v62 = vsub.f32 %v59_v47, %v2587_v50  ;;  %v45_v46 = vld [vmem:[%s3106_s2 + $0x40] sm:$0xff] }
  0x1c   :  { %v2605_v60 = vand.u32 4294901760, %v2596_v56  ;;  %v2620_v7 = vsub.f32 %v58_v55, %v2599_v57  ;;  %v2623_v16 = vand.u32 4294901760, %v56_v6  ;;  %v2632_v24 = vsub.f32 %v57_v61, %v2611_v63 }
  0x1d   :  { %3171 = vst [vmem:[#allocation16_spill] sm:$0xff] %v2593_v54  ;;  %2095 = vmatprep.mubr.f32.mxu0 %v154_v51  ;;  %v357_v58 = vand.u32 4294901760, %v356_v53  ;;  %v363_v59 = vsub.f32 %v2581_v48, %v2593_v54  ;;  %v2617_v2 = vand.u32 4294901760, %v2608_v62  ;;  %v2647_v37 = vand.u32 4294901760, %v54_v33  ;;  %v53_v51 = vld [vmem:[#allocation2] sm:$0xff]  ;;  %v39_v53 = vld [vmem:[%s3106_s2 + $0x10] sm:$0xff] }
  0x1e   :  { %2070 = vmatpush3.xpose.msra.mxu0 %v2493_v8  ;;  %2122 = vmatpush3.xpose.msra.mxu1 %v322_v23  ;;  %3172 = vst [vmem:[#allocation17_spill] sm:$0xff] %v2605_v60  ;;  %v370_v1 = vsub.f32 %v2596_v56, %v2605_v60  ;;  %v2629_v22 = vand.u32 4294901760, %v2620_v7  ;;  %v55_v23 = vld [vmem:[#allocation2 + $0x10] sm:$0xff]  ;;  %v2641_v31 = vand.u32 4294901760, %v2632_v24  ;;  %v2763_v25 = vand.u32 4294901760, %v45_v46 }
  0x1f   :  { %2071 = vmatprep.subr.mxu0 %v2506_v12  ;;  %2123 = vmatprep.subr.mxu1 %v329_v28  ;;  %v364_v0 = vand.u32 4294901760, %v363_v59  ;;  %3173 = vst [vmem:[#allocation18_spill] sm:$0xff] %v2617_v2  ;;  %v377_v19 = vsub.f32 %v2608_v62, %v2617_v2  ;;  %v2635_v26 = vand.u32 4294901760, %v55_v23  ;;  %3177 = vst [vmem:[#allocation22_spill] sm:$0xff] %v2647_v37 }
  0x20   :  { %v371_v18 = vand.u32 4294901760, %v370_v1  ;;  %3174 = vst [vmem:[#allocation19_spill] sm:$0xff] %v2629_v22  ;;  %v384_v29 = vsub.f32 %v2620_v7, %v2629_v22  ;;  %3176 = vst [vmem:[#allocation21_spill] sm:$0xff] %v2641_v31  ;;  %v391_v45 = vsub.f32 %v2632_v24, %v2641_v31  ;;  %v2668_v55 = vsub.f32 %v54_v33, %v2647_v37  ;;  %v44_v31 = vld [vmem:[%s3106_s2 + $0x38] sm:$0xff] }
  0x21   :  { %3175 = vst [vmem:[#allocation20_spill] sm:$0xff] %v2635_v26  ;;  %v2659_v49 = vsub.f32 %v55_v23, %v2635_v26  ;;  %v41_v23 = vld [vmem:[%s3106_s2 + $0x20] sm:$0xff] }
  0x22   :  { %2072 = vmatpush3.xpose.msra.mxu0 %v2506_v12  ;;  %2124 = vmatpush3.xpose.msra.mxu1 %v329_v28  ;;  %v378_v28 = vand.u32 4294901760, %v377_v19  ;;  %v392_v59 = vand.u32 4294901760, %v391_v45 }
  0x23   :  { %2073 = vmatprep.subr.mxu0 %v2526_v20  ;;  %2125 = vmatprep.subr.mxu1 %v336_v36  ;;  %v2679_v1 = vand.u32 4294901760, %v2659_v49 }
  0x25   :  { %3180 = vst [vmem:[#allocation25_spill] sm:$0xff] %v2679_v1 }
  0x26   :  { %2074 = vmatpush3.xpose.msra.mxu0 %v2526_v20  ;;  %2126 = vmatpush3.xpose.msra.mxu1 %v336_v36  ;;  %v2644_v36 = vsub.f32 %v56_v6, %v2623_v16  ;;  %v2681_v6 = vand.u32 4294901760, %v39_v53 }
  0x27   :  { %2075 = vmatprep.subr.mxu0 %v2538_v27  ;;  %2127 = vmatprep.subr.mxu1 %v343_v44 }
  0x28   :  { %v2656_v47 = vand.u32 4294901760, %v2644_v36  ;;  %v2705_v43 = vsub.f32 %v39_v53, %v2681_v6 }
  0x2a   :  { %2076 = vmatpush3.xpose.msra.mxu0 %v2538_v27  ;;  %2128 = vmatpush3.xpose.msra.mxu1 %v343_v44  ;;  %v385_v44 = vand.u32 4294901760, %v384_v29  ;;  %3178 = vst [vmem:[#allocation23_spill] sm:$0xff] %v2656_v47  ;;  %v398_v61 = vsub.f32 %v2644_v36, %v2656_v47  ;;  %v42_v29 = vld [vmem:[%s3106_s2 + $0x28] sm:$0xff]  ;;  %3183 = vst [vmem:[#allocation28_spill] sm:$0xff] %v2705_v43  ;;  %v43_v47 = vld [vmem:[%s3106_s2 + $0x30] sm:$0xff]  ;;  %v3189_v38 = vand.u32 4294901760, %v2705_v43 }
  0x2b   :  { %2077 = vmatprep.subr.mxu0 %v2553_v34  ;;  %2129 = vmatprep.subr.mxu1 %v350_v52  ;;  %v2728_v35 = vand.u32 4294901760, %v43_v47 }
  0x2c   :  { %v399_v33 = vand.u32 4294901760, %v398_v61  ;;  %v2730_v61 = vand.u32 4294901760, %v44_v31 }
  0x2e   :  { %2078 = vmatpush3.xpose.msra.mxu0 %v2553_v34  ;;  %2130 = vmatpush3.xpose.msra.mxu1 %v350_v52  ;;  %v2661_v52 = vand.u32 4294901760, %v38_v39 }
  0x2f   :  { %2079 = vmatprep.subr.mxu0 %v2571_v42  ;;  %2131 = vmatprep.subr.mxu1 %v357_v58 }
  0x32   :  { %2080 = vmatpush3.xpose.msra.mxu0 %v2571_v42  ;;  %2132 = vmatpush3.xpose.msra.mxu1 %v357_v58  ;;  %v40_v58 = vld [vmem:[%s3106_s2 + $0x18] sm:$0xff] }
  0x33   :  { %2081 = vmatprep.subr.mxu0 %v2587_v50  ;;  %2133 = vmatprep.subr.mxu1 %v364_v0  ;;  %v2686_v19 = vand.u32 4294901760, %v40_v58 }
  0x36   :  { %2082 = vmatpush3.xpose.msra.mxu0 %v2587_v50  ;;  %2134 = vmatpush3.xpose.msra.mxu1 %v364_v0  ;;  %v2676_v0 = vand.u32 4294901760, %v53_v51 }
  0x37   :  { %2083 = vmatprep.subr.mxu0 %v2599_v57  ;;  %2135 = vmatprep.subr.mxu1 %v371_v18 }
  0x38   :  { %3179 = vst [vmem:[#allocation24_spill] sm:$0xff] %v2676_v0  ;;  %v2702_v45 = vsub.f32 %v53_v51, %v2676_v0  ;;  %v2719_v51 = vand.u32 4294901760, %v42_v29 }
  0x3a   :  { %2084 = vmatpush3.xpose.msra.mxu0 %v2599_v57  ;;  %2136 = vmatpush3.xpose.msra.mxu1 %v371_v18  ;;  %v2684_v18 = vsub.f32 %v38_v39, %v2661_v52  ;;  %v405_v39 = vsub.f32 %v2659_v49, %v2679_v1  ;;  %v2717_v1 = vsub.f32 %v40_v58, %v2686_v19  ;;  %v2726_v2 = vand.u32 4294901760, %v2702_v45 }
  0x3b   :  { %2085 = vmatprep.subr.mxu0 %v2611_v63  ;;  %2137 = vmatprep.subr.mxu1 %v378_v28  ;;  %v2757_v58 = vsub.f32 %v44_v31, %v2730_v61  ;;  %v47_v31 = vld [vmem:[%s3106_s2 + $0x50] sm:$0xff] }
  0x3c   :  { %3181 = vst [vmem:[#allocation26_spill] sm:$0xff] %v2684_v18  ;;  %3184 = vst [vmem:[#allocation29_spill] sm:$0xff] %v2717_v1  ;;  %v406_v22 = vand.u32 4294901760, %v405_v39  ;;  %v2741_v39 = vsub.f32 %v42_v29, %v2719_v51  ;;  %v419_v54 = vsub.f32 %v2702_v45, %v2726_v2  ;;  %v2754_v29 = vsub.f32 %v43_v47, %v2728_v35 }
  0x3d   :  { %3185 = vst [vmem:[#allocation30_spill] sm:$0xff] %v2726_v2 }
  0x3e   :  { %2086 = vmatpush3.xpose.msra.mxu0 %v2611_v63  ;;  %2138 = vmatpush3.xpose.msra.mxu1 %v378_v28  ;;  %v2693_v28 = vand.u32 4294901760, %v2668_v55  ;;  %3188 = vst [vmem:[#allocation32_spill] sm:$0xff] %v2741_v39  ;;  %v3192_v13 = vand.u32 4294901760, %v2741_v39 }
  0x3f   :  { %2087 = vmatprep.subr.mxu0 %v2623_v16  ;;  %2139 = vmatprep.subr.mxu1 %v385_v44 }
  0x40   :  { %3182 = vst [vmem:[#allocation27_spill] sm:$0xff] %v2693_v28  ;;  %v412_v53 = vsub.f32 %v2668_v55, %v2693_v28 }
  0x42   :  { %2088 = vmatpush3.xpose.msra.mxu0 %v2623_v16  ;;  %2140 = vmatpush3.xpose.msra.mxu1 %v385_v44  ;;  %v2707_v44 = vand.u32 4294901760, %v41_v23 }
  0x43   :  { %2089 = vmatprep.subr.mxu0 %v2635_v26  ;;  %2141 = vmatprep.subr.mxu1 %v392_v59 }
  0x44   :  { %v2734_v60 = vsub.f32 %v41_v23, %v2707_v44  ;;  %v46_v23 = vld [vmem:[%s3106_s2 + $0x48] sm:$0xff] }
  0x45   :  { %v2769_v47 = vand.u32 4294901760, %v46_v23 }
  0x46   :  { %2090 = vmatpush3.xpose.msra.mxu0 %v2635_v26  ;;  %2142 = vmatpush3.xpose.msra.mxu1 %v392_v59  ;;  %3186 = vst [vmem:[#allocation31_spill] sm:$0xff] %v2734_v60  ;;  %v3187_v59 = vand.u32 4294901760, %v2684_v18 }
  0x47   :  { %2091 = vmatprep.subr.mxu0 %v2647_v37  ;;  %2143 = vmatprep.subr.mxu1 %v399_v33 }
  0x48   :  { %v163_v28 = vsub.f32 %v2684_v18, %v3187_v59  ;;  %v413_v59 = vand.u32 4294901760, %v412_v53  ;;  %v3190_v53 = vand.u32 4294901760, %v2717_v1 }
  0x4a   :  { %2092 = vmatpush3.xpose.msra.mxu0 %v2647_v37  ;;  %2144 = vmatpush3.xpose.msra.mxu1 %v399_v33  ;;  %v173_v33 = vsub.f32 %v2705_v43, %v3189_v38  ;;  %v164_v15 = vand.u32 4294901760, %v163_v28  ;;  %v183_v14 = vsub.f32 %v2717_v1, %v3190_v53  ;;  %v48_v38 = vld [vmem:[%s3106_s2 + $0x58] sm:$0xff]  ;;  %v420_v28 = vand.u32 4294901760, %v419_v54 }
  0x4b   :  { %2093 = vmatprep.subr.mxu0 %v2676_v0  ;;  %2145 = vmatprep.subr.mxu1 %v406_v22  ;;  %v3191_v1 = vand.u32 4294901760, %v2734_v60  ;;  %v203_v54 = vsub.f32 %v2741_v39, %v3192_v13  ;;  %v2793_v53 = vsub.f32 %v46_v23, %v2769_v47  ;;  %v2795_v2 = vand.u32 4294901760, %v48_v38 }
  0x4c   :  { %v174_v30 = vand.u32 4294901760, %v173_v33  ;;  %v184_v18 = vand.u32 4294901760, %v183_v14  ;;  %v50_v14 = vld [vmem:[%s3106_s2 + $0x68] sm:$0xff]  ;;  %v3193_v13 = vand.u32 4294901760, %v2754_v29 }
  0x4d   :  { %v193_v43 = vsub.f32 %v2734_v60, %v3191_v1  ;;  %v49_v1 = vld [vmem:[%s3106_s2 + $0x60] sm:$0xff]  ;;  %v204_v60 = vand.u32 4294901760, %v203_v54  ;;  %v3160_v37 = vand.u32 4294901760, %v2793_v53  ;;  %v2819_v26 = vsub.f32 %v48_v38, %v2795_v2 }
  0x4e   :  { %2094 = vmatpush3.xpose.msra.mxu0 %v2676_v0  ;;  %2146 = vmatpush3.xpose.msra.mxu1 %v406_v22  ;;  %v2785_v0 = vsub.f32 %v45_v46, %v2763_v25  ;;  %v2787_v22 = vand.u32 4294901760, %v47_v31  ;;  %v3194_v46 = vand.u32 4294901760, %v2757_v58  ;;  %v2815_v39 = vand.u32 4294901760, %v49_v1 }
  0x4f   :  { %2147 = vmatprep.subr.mxu1 %v413_v59  ;;  %2175 = vmatprep.subr.mxu0 %v2497_v9  ;;  %v194_v33 = vand.u32 4294901760, %v193_v43  ;;  %v52_v43 = vld [vmem:[%s3106_s2 + $0x78] sm:$0xff] }
  0x50   :  { %v223_v23 = vsub.f32 %v2757_v58, %v3194_v46  ;;  %v3162_v46 = vand.u32 4294901760, %v2819_v26 }
  0x51   :  { %2096 = vmatmul.mubr.f32.vlgmr.msra.gmra.mxu0 %v164_v15  ;;  %v213_v15 = vsub.f32 %v2754_v29, %v3193_v13  ;;  %v2821_v13 = vand.u32 4294901760, %v50_v14 }
  0x52   :  { %2148 = vmatpush3.xpose.msra.mxu1 %v413_v59  ;;  %2176 = vmatpush3.xpose.msra.mxu0 %v2497_v9  ;;  %v3161_v59 = vand.u32 4294901760, %v2785_v0  ;;  %v2813_v9 = vsub.f32 %v47_v31, %v2787_v22  ;;  %v224_v31 = vand.u32 4294901760, %v223_v23 }
  0x53   :  { %2149 = vmatprep.subr.mxu1 %v420_v28  ;;  %2177 = vmatprep.subr.mxu0 %v2500_v10  ;;  %v2847_v23 = vsub.f32 %v50_v14, %v2821_v13 }
  0x54   :  { %2098 = vmatprep.mubr.f32.mxu0 %v174_v30  ;;  %v51_v30 = vld [vmem:[%s3106_s2 + $0x70] sm:$0xff]  ;;  %v233_v38 = vsub.f32 %v2785_v0, %v3161_v59  ;;  %v252_v54 = vand.u32 4294901760, %v2813_v9  ;;  %v263_v59 = vsub.f32 %v2819_v26, %v3162_v46 }
  0x55   :  { %2099 = vmatmul.mubr.f32.gmra.mxu0 %v184_v18  ;;  %v214_v18 = vand.u32 4294901760, %v213_v15  ;;  %v243_v15 = vsub.f32 %v2793_v53, %v3160_v37 }
  0x56   :  { %2150 = vmatpush3.xpose.msra.mxu1 %v420_v28  ;;  %2178 = vmatpush3.xpose.msra.mxu0 %v2500_v10  ;;  %v2837_v28 = vsub.f32 %v49_v1, %v2815_v39  ;;  %v2839_v10 = vand.u32 4294901760, %v51_v30  ;;  %v253_v1 = vsub.f32 %v2813_v9, %v252_v54 }
  0x57   :  { %2179 = vmatprep.subr.mxu0 %v2503_v11  ;;  %2231 = vmatprep.subr.mxu1 %v2487_v3 }
  0x58   :  { %2101 = vmatprep.mubr.f32.mxu0 %v194_v33  ;;  %v2849_v33 = vand.u32 4294901760, %v52_v43  ;;  %v272_v14 = vand.u32 4294901760, %v2837_v28  ;;  %v2861_v37 = vsub.f32 %v51_v30, %v2839_v10  ;;  %v254_v30 = vand.u32 4294901760, %v253_v1 }
  0x59   :  { %2152 = vmatmul.mubr.f32.vlgmr.msra.gmra.mxu1 %v2661_v52  ;;  %2102 = vmatmul.mubr.f32.gmra.mxu0 %v204_v60  ;;  %v234_v60 = vand.u32 4294901760, %v233_v38 }
  0x5a   :  { %2180 = vmatpush3.xpose.msra.mxu0 %v2503_v11  ;;  %2232 = vmatpush3.xpose.msra.mxu1 %v2487_v3  ;;  %v244_v11 = vand.u32 4294901760, %v243_v15  ;;  %v2869_v38 = vsub.f32 %v52_v43, %v2849_v33  ;;  %v292_v15 = vand.u32 4294901760, %v2861_v37 }
  0x5b   :  { %2181 = vmatprep.subr.mxu0 %v2519_v17  ;;  %2233 = vmatprep.subr.mxu1 %v2489_v4 }
  0x5c   :  { %2154 = vmatprep.mubr.f32.mxu1 %v2681_v6  ;;  %2104 = vmatprep.mubr.f32.mxu0 %v214_v18  ;;  %v282_v18 = vand.u32 4294901760, %v2847_v23  ;;  %v302_v46 = vand.u32 4294901760, %v2869_v38 }
  0x5d   :  { %2155 = vmatmul.mubr.f32.gmra.mxu1 %v2686_v19  ;;  %2105 = vmatmul.mubr.f32.gmra.mxu0 %v224_v31  ;;  %v273_v31 = vsub.f32 %v2837_v28, %v272_v14 }
  0x5e   :  { %2182 = vmatpush3.xpose.msra.mxu0 %v2519_v17  ;;  %2234 = vmatpush3.xpose.msra.mxu1 %v2489_v4  ;;  %v264_v17 = vand.u32 4294901760, %v263_v59  ;;  %v283_v43 = vsub.f32 %v2847_v23, %v282_v18  ;;  %v293_v59 = vsub.f32 %v2861_v37, %v292_v15 }
  0x5f   :  { %2183 = vmatprep.subr.mxu0 %v2529_v21  ;;  %2235 = vmatprep.subr.mxu1 %v2491_v5 }
  0x60   :  { %2157 = vmatprep.mubr.f32.mxu1 %v2707_v44  ;;  %2107 = vmatprep.mubr.f32.mxu0 %v234_v60  ;;  %v274_v60 = vand.u32 4294901760, %v273_v31  ;;  %v284_v1 = vand.u32 4294901760, %v283_v43  ;;  %v3207_v31 = vld [vmem:[#allocation32_spill] sm:$0xff] }
  0x61   :  { %2158 = vmatmul.mubr.f32.gmra.mxu1 %v2719_v51  ;;  %2108 = vmatmul.mubr.f32.gmra.mxu0 %v244_v11  ;;  %v294_v11 = vand.u32 4294901760, %v293_v59  ;;  %v3211_v59 = vld [vmem:[#allocation12_spill] sm:$0xff] }
  0x62   :  { %2184 = vmatpush3.xpose.msra.mxu0 %v2529_v21  ;;  %2236 = vmatpush3.xpose.msra.mxu1 %v2491_v5  ;;  %v303_v21 = vsub.f32 %v2869_v38, %v302_v46 }
  0x63   :  { %2185 = vmatprep.subr.mxu0 %v2547_v32  ;;  %2237 = vmatprep.subr.mxu1 %v2493_v8 }
  0x64   :  { %2160 = vmatprep.mubr.f32.mxu1 %v2728_v35  ;;  %2110 = vmatprep.mubr.f32.mxu0 %v254_v30  ;;  %v304_v30 = vand.u32 4294901760, %v303_v21  ;;  %v3214_v21 = vld [vmem:[#allocation14_spill] sm:$0xff] }
  0x65   :  { %2161 = vmatmul.mubr.f32.gmra.mxu1 %v2730_v61  ;;  %2111 = vmatmul.mubr.f32.gmra.mxu0 %v264_v17  ;;  %v3208_v17 = vld [vmem:[#allocation11_spill] sm:$0xff] }
  0x66   :  { %2186 = vmatpush3.xpose.msra.mxu0 %v2547_v32  ;;  %2238 = vmatpush3.xpose.msra.mxu1 %v2493_v8  ;;  %v3195_v32 = vand.u32 4294901760, %v2567_v41 }
  0x67   :  { %2187 = vmatprep.subr.mxu0 %v2564_v40  ;;  %2239 = vmatprep.subr.mxu1 %v2506_v12 }
  0x68   :  { %2163 = vmatprep.mubr.f32.mxu1 %v2763_v25  ;;  %2113 = vmatprep.mubr.f32.mxu0 %v274_v60 }
  0x69   :  { %2164 = vmatmul.mubr.f32.gmra.mxu1 %v2769_v47  ;;  %2114 = vmatmul.mubr.f32.gmra.mxu0 %v284_v1  ;;  %v3213_v1 = vand.u32 4294901760, %v3207_v31 }
  0x6a   :  { %2188 = vmatpush3.xpose.msra.mxu0 %v2564_v40  ;;  %2240 = vmatpush3.xpose.msra.mxu1 %v2506_v12  ;;  %v3196_v40 = vld [vmem:[#allocation20_spill] sm:$0xff] }
  0x6b   :  { %2189 = vmatprep.subr.mxu0 %v2581_v48  ;;  %2241 = vmatprep.subr.mxu1 %v2526_v20 }
  0x6c   :  { %2166 = vmatprep.mubr.f32.mxu1 %v2787_v22  ;;  %2116 = vmatprep.mubr.f32.mxu0 %v294_v11  ;;  %v3216_v11 = vand.u32 4294901760, %v2757_v58 }
  0x6d   :  { %2167 = vmatmul.mubr.f32.gmra.mxu1 %v2795_v2  ;;  %2117 = vmatmul.mubr.f32.gmra.mxu0 %v304_v30  ;;  %v3217_v30 = vld [vmem:[#allocation15_spill] sm:$0xff] }
  0x6e   :  { %2190 = vmatpush3.xpose.msra.mxu0 %v2581_v48  ;;  %2242 = vmatpush3.xpose.msra.mxu1 %v2526_v20  ;;  %v3198_v48 = vld [vmem:[#allocation8_spill] sm:$0xff] }
  0x6f   :  { %2191 = vmatprep.subr.mxu0 %v2596_v56  ;;  %2243 = vmatprep.subr.mxu1 %v2538_v27 }
  0x70   :  { %2169 = vmatprep.mubr.f32.mxu1 %v2815_v39  ;;  %2207 = vmatprep.mubr.f32.mxu0 %v2567_v41  ;;  %v3197_v41 = vld [vmem:[#allocation22_spill] sm:$0xff] }
  0x71   :  { %2170 = vmatmul.mubr.f32.gmra.mxu1 %v2821_v13 }
  0x72   :  { %2192 = vmatpush3.xpose.msra.mxu0 %v2596_v56  ;;  %2244 = vmatpush3.xpose.msra.mxu1 %v2538_v27  ;;  %v3199_v56 = vld [vmem:[#allocation26_spill] sm:$0xff] }
  0x73   :  { %2193 = vmatprep.subr.mxu0 %v2608_v62  ;;  %2245 = vmatprep.subr.mxu1 %v2553_v34 }
  0x74   :  { %2172 = vmatprep.mubr.f32.mxu1 %v2839_v10 }
  0x75   :  { %2173 = vmatmul.mubr.f32.gmra.mxu1 %v2849_v33 }
  0x76   :  { %2194 = vmatpush3.xpose.msra.mxu0 %v2608_v62  ;;  %2246 = vmatpush3.xpose.msra.mxu1 %v2553_v34  ;;  %v3200_v62 = vld [vmem:[#allocation24_spill] sm:$0xff] }
  0x77   :  { %2195 = vmatprep.subr.mxu0 %v2620_v7  ;;  %2247 = vmatprep.subr.mxu1 %v2571_v42 }
  0x78   :  { %2263 = vmatprep.mubr.f32.mxu1 %v3195_v32 }
  0x7a   :  { %2196 = vmatpush3.xpose.msra.mxu0 %v2620_v7  ;;  %2248 = vmatpush3.xpose.msra.mxu1 %v2571_v42  ;;  %v3201_v7 = vld [vmem:[#allocation9_spill] sm:$0xff] }
  0x7b   :  { %2197 = vmatprep.subr.mxu0 %v2632_v24  ;;  %2249 = vmatprep.subr.mxu1 %v2587_v50 }
  0x7e   :  { %2198 = vmatpush3.xpose.msra.mxu0 %v2632_v24  ;;  %2250 = vmatpush3.xpose.msra.mxu1 %v2587_v50  ;;  %v3202_v24 = vld [vmem:[#allocation28_spill] sm:$0xff] }
  0x7f   :  { %2199 = vmatprep.subr.mxu0 %v2644_v36  ;;  %2251 = vmatprep.subr.mxu1 %v2599_v57  ;;  %v3209_v43 = vand.u32 4294901760, %v3202_v24 }
  0x82   :  { %2200 = vmatpush3.xpose.msra.mxu0 %v2644_v36  ;;  %2252 = vmatpush3.xpose.msra.mxu1 %v2599_v57  ;;  %v3203_v36 = vld [vmem:[#allocation29_spill] sm:$0xff] }
  0x83   :  { %2201 = vmatprep.subr.mxu0 %v2659_v49  ;;  %2253 = vmatprep.subr.mxu1 %v2611_v63  ;;  %v3210_v60 = vand.u32 4294901760, %v3203_v36 }
  0x86   :  { %2202 = vmatpush3.xpose.msra.mxu0 %v2659_v49  ;;  %2254 = vmatpush3.xpose.msra.mxu1 %v2611_v63  ;;  %v3204_v49 = vld [vmem:[#allocation10_spill] sm:$0xff] }
  0x87   :  { %2203 = vmatprep.subr.mxu0 %v2668_v55  ;;  %2255 = vmatprep.subr.mxu1 %v2623_v16 }
  0x8a   :  { %2204 = vmatpush3.xpose.msra.mxu0 %v2668_v55  ;;  %2256 = vmatpush3.xpose.msra.mxu1 %v2623_v16  ;;  %v3205_v55 = vld [vmem:[#allocation31_spill] sm:$0xff] }
  0x8b   :  { %2205 = vmatprep.subr.mxu0 %v2702_v45  ;;  %2257 = vmatprep.subr.mxu1 %v3196_v40 }
  0x8e   :  { %2206 = vmatpush3.xpose.msra.mxu0 %v2702_v45  ;;  %2258 = vmatpush3.xpose.msra.mxu1 %v3196_v40  ;;  %v3206_v45 = vand.u32 4294901760, %v3199_v56 }
  0x8f   :  { %2259 = vmatprep.subr.mxu1 %v3197_v41  ;;  %2287 = vmatprep.subr.mxu0 %v3198_v48 }
  0x91   :  { %2208 = vmatmul.mubr.f32.vlgmr.msra.gmra.mxu0 %v3199_v56 }
  0x92   :  { %2260 = vmatpush3.xpose.msra.mxu1 %v3197_v41  ;;  %2288 = vmatpush3.xpose.msra.mxu0 %v3198_v48 }
  0x93   :  { %2261 = vmatprep.subr.mxu1 %v3200_v62  ;;  %2289 = vmatprep.subr.mxu0 %v3201_v7 }
  0x94   :  { %2210 = vmatprep.mubr.f32.mxu0 %v3202_v24 }
  0x95   :  { %2211 = vmatmul.mubr.f32.gmra.mxu0 %v3203_v36 }
  0x96   :  { %2262 = vmatpush3.xpose.msra.mxu1 %v3200_v62  ;;  %2290 = vmatpush3.xpose.msra.mxu0 %v3201_v7 }
  0x97   :  { %2291 = vmatprep.subr.mxu0 %v3204_v49  ;;  %2343 = vmatprep.subr.mxu1 %v2487_v3 }
  0x98   :  { %2213 = vmatprep.mubr.f32.mxu0 %v3205_v55 }
  0x99   :  { %2264 = vmatmul.mubr.f32.vlgmr.msra.gmra.mxu1 %v3206_v45  ;;  %2214 = vmatmul.mubr.f32.gmra.mxu0 %v3207_v31 }
  0x9a   :  { %2292 = vmatpush3.xpose.msra.mxu0 %v3204_v49  ;;  %2344 = vmatpush3.xpose.msra.mxu1 %v2487_v3  ;;  %v3212_v3 = vand.u32 4294901760, %v3205_v55 }
  0x9b   :  { %2293 = vmatprep.subr.mxu0 %v3208_v17  ;;  %2345 = vmatprep.subr.mxu1 %v2489_v4 }
  0x9c   :  { %2266 = vmatprep.mubr.f32.mxu1 %v3209_v43  ;;  %2216 = vmatprep.mubr.f32.mxu0 %v2754_v29 }
  0x9d   :  { %2267 = vmatmul.mubr.f32.gmra.mxu1 %v3210_v60  ;;  %2217 = vmatmul.mubr.f32.gmra.mxu0 %v2757_v58  ;;  %v3220_v58 = vld [vmem:[#allocation16_spill] sm:$0xff] }
  0x9e   :  { %2294 = vmatpush3.xpose.msra.mxu0 %v3208_v17  ;;  %2346 = vmatpush3.xpose.msra.mxu1 %v2489_v4  ;;  %v3215_v4 = vand.u32 4294901760, %v2754_v29  ;;  %v3219_v29 = vand.u32 4294901760, %v2793_v53 }
  0x9f   :  { %2295 = vmatprep.subr.mxu0 %v3211_v59  ;;  %2347 = vmatprep.subr.mxu1 %v2491_v5 }
  0xa0   :  { %2269 = vmatprep.mubr.f32.mxu1 %v3212_v3  ;;  %2219 = vmatprep.mubr.f32.mxu0 %v2785_v0 }
  0xa1   :  { %2270 = vmatmul.mubr.f32.gmra.mxu1 %v3213_v1  ;;  %2220 = vmatmul.mubr.f32.gmra.mxu0 %v2793_v53  ;;  %v1435_v53 = vld [vmem:[%s3104_s0] sm:$0xff] }
  0xa2   :  { %2296 = vmatpush3.xpose.msra.mxu0 %v3211_v59  ;;  %2348 = vmatpush3.xpose.msra.mxu1 %v2491_v5  ;;  %v3218_v5 = vand.u32 4294901760, %v2785_v0  ;;  %v3222_v0 = vld [vmem:[#allocation17_spill] sm:$0xff] }
  0xa3   :  { %2297 = vmatprep.subr.mxu0 %v3214_v21  ;;  %2349 = vmatprep.subr.mxu1 %v2493_v8 }
  0xa4   :  { %2272 = vmatprep.mubr.f32.mxu1 %v3215_v4  ;;  %2222 = vmatprep.mubr.f32.mxu0 %v2813_v9  ;;  %v3225_v9 = vld [vmem:[#allocation19_spill] sm:$0xff] }
  0xa5   :  { %2273 = vmatmul.mubr.f32.gmra.mxu1 %v3216_v11  ;;  %2223 = vmatmul.mubr.f32.gmra.mxu0 %v2819_v26 }
  0xa6   :  { %2298 = vmatpush3.xpose.msra.mxu0 %v3214_v21  ;;  %2350 = vmatpush3.xpose.msra.mxu1 %v2493_v8  ;;  %v3221_v8 = vand.u32 4294901760, %v2819_v26  ;;  %v2457_v26 = vmov 0  }
  0xa7   :  { %2299 = vmatprep.subr.mxu0 %v3217_v30  ;;  %2351 = vmatprep.subr.mxu1 %v2506_v12 }
  0xa8   :  { %2275 = vmatprep.mubr.f32.mxu1 %v3218_v5  ;;  %2225 = vmatprep.mubr.f32.mxu0 %v2837_v28 }
  0xa9   :  { %2276 = vmatmul.mubr.f32.gmra.mxu1 %v3219_v29  ;;  %2226 = vmatmul.mubr.f32.gmra.mxu0 %v2847_v23 }
  0xaa   :  { %2300 = vmatpush3.xpose.msra.mxu0 %v3217_v30  ;;  %2352 = vmatpush3.xpose.msra.mxu1 %v2506_v12  ;;  %v3223_v12 = vld [vmem:[#allocation13_spill] sm:$0xff] }
  0xab   :  { %2301 = vmatprep.subr.mxu0 %v3220_v58  ;;  %2353 = vmatprep.subr.mxu1 %v2526_v20 }
  0xac   :  { %2278 = vmatprep.mubr.f32.mxu1 %v252_v54  ;;  %2228 = vmatprep.mubr.f32.mxu0 %v2861_v37  ;;  %v3227_v37 = vld [vmem:[#allocation23_spill] sm:$0xff] }
  0xad   :  { %2279 = vmatmul.mubr.f32.gmra.mxu1 %v3221_v8  ;;  %2229 = vmatmul.mubr.f32.gmra.mxu0 %v2869_v38 }
  0xae   :  { %2302 = vmatpush3.xpose.msra.mxu0 %v3220_v58  ;;  %2354 = vmatpush3.xpose.msra.mxu1 %v2526_v20  ;;  %v3224_v20 = vld [vmem:[#allocation18_spill] sm:$0xff] }
  0xaf   :  { %2303 = vmatprep.subr.mxu0 %v3222_v0  ;;  %2355 = vmatprep.subr.mxu1 %v2538_v27 }
  0xb0   :  { %2281 = vmatprep.mubr.f32.mxu1 %v272_v14  ;;  %2319 = vmatprep.mubr.f32.mxu0 %v3223_v12 }
  0xb1   :  { %2282 = vmatmul.mubr.f32.gmra.mxu1 %v282_v18  ;;  %2405 = vset.pattern.permute.xlu0 %v2457_v26 }
  0xb2   :  { %2304 = vmatpush3.xpose.msra.mxu0 %v3222_v0  ;;  %2356 = vmatpush3.xpose.msra.mxu1 %v2538_v27  ;;  %v3226_v27 = vld [vmem:[#allocation21_spill] sm:$0xff] }
  0xb3   :  { %2305 = vmatprep.subr.mxu0 %v3224_v20  ;;  %2357 = vmatprep.subr.mxu1 %v2553_v34 }
  0xb4   :  { %2284 = vmatprep.mubr.f32.mxu1 %v292_v15  ;;  %1454 = vperm.xlu0 %2405, %v1435_v53  }
  0xb5   :  { %2285 = vmatmul.mubr.f32.gmra.mxu1 %v302_v46 }
  0xb6   :  { %2306 = vmatpush3.xpose.msra.mxu0 %v3224_v20  ;;  %2358 = vmatpush3.xpose.msra.mxu1 %v2553_v34  ;;  %v3228_v34 = vld [vmem:[#allocation25_spill] sm:$0xff] }
  0xb7   :  { %2307 = vmatprep.subr.mxu0 %v3225_v9  ;;  %2359 = vmatprep.subr.mxu1 %v2571_v42 }
  0xb8   :  { %2375 = vmatprep.mubr.f32.mxu1 %v3223_v12 }
  0xba   :  { %2308 = vmatpush3.xpose.msra.mxu0 %v3225_v9  ;;  %2360 = vmatpush3.xpose.msra.mxu1 %v2571_v42  ;;  %v3229_v42 = vld [vmem:[#allocation27_spill] sm:$0xff] }
  0xbb   :  { %2309 = vmatprep.subr.mxu0 %v3226_v27  ;;  %2361 = vmatprep.subr.mxu1 %v2587_v50 }
  0xbe   :  { %2310 = vmatpush3.xpose.msra.mxu0 %v3226_v27  ;;  %2362 = vmatpush3.xpose.msra.mxu1 %v2587_v50  ;;  %v3230_v50 = vld [vmem:[#allocation30_spill] sm:$0xff] }
  0xbf   :  { %2311 = vmatprep.subr.mxu0 %v3227_v37  ;;  %2363 = vmatprep.subr.mxu1 %v2599_v57 }
  0xc2   :  { %2312 = vmatpush3.xpose.msra.mxu0 %v3227_v37  ;;  %2364 = vmatpush3.xpose.msra.mxu1 %v2599_v57 }
  0xc3   :  { %2313 = vmatprep.subr.mxu0 %v3228_v34  ;;  %2365 = vmatprep.subr.mxu1 %v2611_v63 }
  0xc6   :  { %2314 = vmatpush3.xpose.msra.mxu0 %v3228_v34  ;;  %2366 = vmatpush3.xpose.msra.mxu1 %v2611_v63 }
  0xc7   :  { %2315 = vmatprep.subr.mxu0 %v3229_v42  ;;  %2367 = vmatprep.subr.mxu1 %v2623_v16 }
  0xca   :  { %2316 = vmatpush3.xpose.msra.mxu0 %v3229_v42  ;;  %2368 = vmatpush3.xpose.msra.mxu1 %v2623_v16 }
  0xcb   :  { %2317 = vmatprep.subr.mxu0 %v3230_v50  ;;  %2369 = vmatprep.subr.mxu1 %v3196_v40 }
  0xce   :  { %2318 = vmatpush3.xpose.msra.mxu0 %v3230_v50  ;;  %2370 = vmatpush3.xpose.msra.mxu1 %v3196_v40 }
  0xcf   :  { %2371 = vmatprep.subr.mxu1 %v3197_v41 }
  0xd1   :  { %2320 = vmatmul.mubr.f32.vlgmr.msra.gmra.mxu0 %v2661_v52 }
  0xd2   :  { %2372 = vmatpush3.xpose.msra.mxu1 %v3197_v41  ;;  %2322 = vmatprep.mubr.f32.mxu0 %v2681_v6 }
  0xd3   :  { %2373 = vmatprep.subr.mxu1 %v3200_v62 }
  0xd5   :  { %2323 = vmatmul.mubr.f32.gmra.mxu0 %v2686_v19 }
  0xd6   :  { %2374 = vmatpush3.xpose.msra.mxu1 %v3200_v62  ;;  %2325 = vmatprep.mubr.f32.mxu0 %v2707_v44 }
  0xd9   :  { %2376 = vmatmul.mubr.f32.vlgmr.msra.gmra.mxu1 %v2661_v52  ;;  %2326 = vmatmul.mubr.f32.gmra.mxu0 %v2719_v51 }
  0xda   :  { %2378 = vmatprep.mubr.f32.mxu1 %v2681_v6  ;;  %2328 = vmatprep.mubr.f32.mxu0 %v2728_v35 }
  0xdd   :  { %2379 = vmatmul.mubr.f32.gmra.mxu1 %v2686_v19  ;;  %2329 = vmatmul.mubr.f32.gmra.mxu0 %v2730_v61 }
  0xde   :  { %2381 = vmatprep.mubr.f32.mxu1 %v2707_v44  ;;  %2331 = vmatprep.mubr.f32.mxu0 %v2763_v25 }
  0xe1   :  { %2382 = vmatmul.mubr.f32.gmra.mxu1 %v2719_v51  ;;  %2332 = vmatmul.mubr.f32.gmra.mxu0 %v2769_v47 }
  0xe2   :  { %2384 = vmatprep.mubr.f32.mxu1 %v2728_v35  ;;  %2334 = vmatprep.mubr.f32.mxu0 %v2787_v22 }
  0xe5   :  { %2385 = vmatmul.mubr.f32.gmra.mxu1 %v2730_v61  ;;  %2335 = vmatmul.mubr.f32.gmra.mxu0 %v2795_v2 }
  0xe6   :  { %2387 = vmatprep.mubr.f32.mxu1 %v2763_v25  ;;  %2337 = vmatprep.mubr.f32.mxu0 %v2815_v39 }
  0xe9   :  { %2388 = vmatmul.mubr.f32.gmra.mxu1 %v2769_v47  ;;  %2338 = vmatmul.mubr.f32.gmra.mxu0 %v2821_v13 }
  0xea   :  { %2390 = vmatprep.mubr.f32.mxu1 %v2787_v22  ;;  %2340 = vmatprep.mubr.f32.mxu0 %v2839_v10 }
  0xed   :  { %2391 = vmatmul.mubr.f32.gmra.mxu1 %v2795_v2  ;;  %2341 = vmatmul.mubr.f32.gmra.mxu0 %v2849_v33 }
  0xee   :  { %2393 = vmatprep.mubr.f32.mxu1 %v2815_v39 }
  0xf1   :  { %2394 = vmatmul.mubr.f32.gmra.mxu1 %v2821_v13 }
  0xf2   :  { %2396 = vmatprep.mubr.f32.mxu1 %v2839_v10 }
  0xf5   :  { %2397 = vmatmul.mubr.f32.gmra.mxu1 %v2849_v33 }
 0x111   :  { %v2097_v25 = vpop.f32.mrf.mxu0 }
 0x113   :  { %v156_v35 = vpop.f32.mrf.mxu0 }
 0x115   :  { %v2100_v57 = vpop.f32.mrf.mxu0 }
 0x117   :  { %v176_v63 = vpop.f32.mrf.mxu0 }
 0x119   :  { %v2153_v16 = vpop.f32.mrf.mxu1  ;;  %v2103_v52 = vpop.f32.mrf.mxu0 }
 0x11b   :  { %v457_v6 = vpop.f32.mrf.mxu1  ;;  %v196_v19 = vpop.f32.mrf.mxu0 }
 0x11c   :  { %v458_v44 = vadd.f32 %v457_v6, %v156_v35 }
 0x11d   :  { %v2156_v2 = vpop.f32.mrf.mxu1  ;;  %v2106_v61 = vpop.f32.mrf.mxu0 }
 0x11f   :  { %v469_v51 = vpop.f32.mrf.mxu1  ;;  %v216_v47 = vpop.f32.mrf.mxu0 }
 0x121   :  { %v2159_v39 = vpop.f32.mrf.mxu1  ;;  %v2109_v22 = vpop.f32.mrf.mxu0 }
 0x123   :  { %v481_v13 = vpop.f32.mrf.mxu1  ;;  %v236_v54 = vpop.f32.mrf.mxu0 }
 0x125   :  { %v2162_v28 = vpop.f32.mrf.mxu1  ;;  %v2112_v10 = vpop.f32.mrf.mxu0 }
 0x127   :  { %v493_v46 = vpop.f32.mrf.mxu1  ;;  %v256_v23 = vpop.f32.mrf.mxu0 }
 0x129   :  { %v2165_v33 = vpop.f32.mrf.mxu1  ;;  %v2115_v14 = vpop.f32.mrf.mxu0 }
 0x12b   :  { %v505_v18 = vpop.f32.mrf.mxu1  ;;  %v276_v38 = vpop.f32.mrf.mxu0 }
 0x12d   :  { %v2168_v15 = vpop.f32.mrf.mxu1  ;;  %v2118_v32 = vpop.f32.mrf.mxu0 }
 0x12f   :  { %v517_v40 = vpop.f32.mrf.mxu1  ;;  %v296_v41 = vpop.f32.mrf.mxu0 }
 0x131   :  { %v2171_v48 = vpop.f32.mrf.mxu1 }
 0x133   :  { %v529_v56 = vpop.f32.mrf.mxu1 }
 0x135   :  { %v2174_v62 = vpop.f32.mrf.mxu1 }
 0x137   :  { %v541_v7 = vpop.f32.mrf.mxu1 }
 0x151   :  { %v2209_v24 = vpop.f32.mrf.mxu0 }
 0x153   :  { %v651_v36 = vpop.f32.mrf.mxu0 }
 0x154   :  { %v652_v49 = vadd.f32 %v651_v36, %v458_v44 }
 0x155   :  { %v2212_v55 = vpop.f32.mrf.mxu0 }
 0x156   :  { %v1838_v55 = vld [vmem:[%s3105_s1] ss:$0 sm:$0xff]  ;;  %s2458_s1 = smov [#allocation5]  }
 0x157   :  { %v665_v45 = vpop.f32.mrf.mxu0  ;;  %s1829_s28 = sshll.u32 %s2458_s1, 4  ;;  %s1830_s28 = int_to_ptr.vmem [resolvable:$true] %s1829_s28 }
 0x158   :  { %v1455_v45 = vpop.permute.xlu0 %1454  ;;  %s2430_s29 = scalar_lea.vmem %s1830_s28, 128  ;;  %p2435_p6 = scmp.lt.s32.totalorder %s1830_s28, %s1830_s28 }
 0x159   :  { %v2265_v31 = vpop.f32.mrf.mxu1  ;;  %v2215_v17 = vpop.f32.mrf.mxu0  ;;  %p2431_p5 = scmp.ne.s32.totalorder %s1830_s28, %s2430_s29  ;;  %p2436_p7 = scmp.lt.s32.totalorder %s2430_s29, %s2430_s29 }
 0x15a   :  { %v1538_v17 = vsub.f32 %v1455_v45, %v1838_v55 }
 0x15b   :  { %v845_v43 = vpop.f32.mrf.mxu1  ;;  %v679_v60 = vpop.f32.mrf.mxu0  ;;  %p2437_p8 = por %p2436_p7, %p2435_p6 }
 0x15c   :  { %v846_v6 = vadd.f32 %v845_v43, %v652_v49  ;;  %v1665_v60 = vlaneseq }
 0x15d   :  { %v2268_v59 = vpop.f32.mrf.mxu1  ;;  %v2218_v3 = vpop.f32.mrf.mxu0  ;;  %p2438_p9 = pnand %p2437_p8, %p2431_p5 }
 0x15e   :  { %v1554_v3 = vand.u32 2147483647, %v1538_v17 }
 0x15f   :  { %v861_v1 = vpop.f32.mrf.mxu1  ;;  %v693_v21 = vpop.f32.mrf.mxu0 }
 0x160   :  { %v1666_v21 = vshrl.u32 %v1665_v60, 7 }
 0x161   :  { %v2271_v4 = vpop.f32.mrf.mxu1  ;;  %v2221_v11 = vpop.f32.mrf.mxu0 }
 0x162   :  { %v1700_v4 = vand.u32 127, %v1665_v60  ;;  %v1839_v11 = vadd.f32 -1.0, %v1554_v3 }
 0x163   :  { %v877_v30 = vpop.f32.mrf.mxu1  ;;  %v707_v5 = vpop.f32.mrf.mxu0 }
 0x164   :  { %vm1719_vm0 = vcmp.lt.s32.totalorder %v1700_v4, 8  ;;  %vm1736_vm1 = vcmp.ne.s32.totalorder %v1666_v21, %v1700_v4  ;;  %vm1586_vm2 = vcmp.gt.f32.partialorder %v1839_v11, 0.0 }
 0x165   :  { %v2274_v29 = vpop.f32.mrf.mxu1  ;;  %v2224_v58 = vpop.f32.mrf.mxu0  ;;  %vm1752_vm3 = vmand %vm1719_vm0, %vm1736_vm1 }
 0x167   :  { %v893_v8 = vpop.f32.mrf.mxu1  ;;  %v721_v0 = vpop.f32.mrf.mxu0 }
 0x169   :  { %v2277_v12 = vpop.f32.mrf.mxu1  ;;  %v2227_v26 = vpop.f32.mrf.mxu0 }
 0x16b   :  { %v909_v53 = vpop.f32.mrf.mxu1  ;;  %v735_v20 = vpop.f32.mrf.mxu0 }
 0x16d   :  { %v2280_v9 = vpop.f32.mrf.mxu1  ;;  %v2230_v27 = vpop.f32.mrf.mxu0 }
 0x16f   :  { %v925_v37 = vpop.f32.mrf.mxu1  ;;  %v749_v34 = vpop.f32.mrf.mxu0 }
 0x171   :  { %v2283_v42 = vpop.f32.mrf.mxu1 }
 0x173   :  { %v941_v50 = vpop.f32.mrf.mxu1 }
 0x175   :  { %v2286_v25 = vpop.f32.mrf.mxu1 }
 0x177   :  { %v957_v35 = vpop.f32.mrf.mxu1 }
 0x191   :  { %v2321_v57 = vpop.f32.mrf.mxu0 }
 0x193   :  { %v1084_v63 = vpop.f32.mrf.mxu0 }
 0x194   :  { %v1085_v2 = vadd.f32 %v1084_v63, %v846_v6 }
 0x195   :  { %v2324_v16 = vpop.f32.mrf.mxu0 }
 0x197   :  { %v1096_v52 = vpop.f32.mrf.mxu0 }
 0x199   :  { %v2377_v19 = vpop.f32.mrf.mxu1  ;;  %v2327_v44 = vpop.f32.mrf.mxu0 }
 0x19b   :  { %v1261_v61 = vpop.f32.mrf.mxu1  ;;  %v1108_v51 = vpop.f32.mrf.mxu0 }
 0x19c   :  { %v1262_v47 = vadd.f32 %v1261_v61, %v1085_v2 }
 0x19d   :  { %v2380_v39 = vpop.f32.mrf.mxu1  ;;  %v2330_v22 = vpop.f32.mrf.mxu0 }
 0x19e   :  { %v1355_v13 = vmul.f32 1.442695, %v1262_v47 }
 0x19f   :  { %v1273_v54 = vpop.f32.mrf.mxu1  ;;  %v1120_v28 = vpop.f32.mrf.mxu0 }
 0x1a0   :  { %2406 = vpow2.f32 %v1355_v13 }
 0x1a1   :  { %v2383_v10 = vpop.f32.mrf.mxu1  ;;  %v2333_v46 = vpop.f32.mrf.mxu0 }
 0x1a3   :  { %v1285_v23 = vpop.f32.mrf.mxu1  ;;  %v1132_v33 = vpop.f32.mrf.mxu0 }
 0x1a5   :  { %v2386_v14 = vpop.f32.mrf.mxu1  ;;  %v2336_v18 = vpop.f32.mrf.mxu0 }
 0x1a7   :  { %v1297_v38 = vpop.f32.mrf.mxu1  ;;  %v1144_v15 = vpop.f32.mrf.mxu0 }
 0x1a9   :  { %v2389_v32 = vpop.f32.mrf.mxu1  ;;  %v2339_v40 = vpop.f32.mrf.mxu0 }
 0x1ab   :  { %v1309_v41 = vpop.f32.mrf.mxu1  ;;  %v1156_v48 = vpop.f32.mrf.mxu0 }
 0x1ad   :  { %v2407_v56 = vpop.eup %2406  ;;  %v2392_v62 = vpop.f32.mrf.mxu1 }
 0x1ae   :  { %v2342_v7 = vpop.f32.mrf.mxu0  ;;  %v1387_v24 = vadd.f32 1e-06, %v2407_v56 }
 0x1af   :  { %v1321_v36 = vpop.f32.mrf.mxu1 }
 0x1b0   :  { %v1168_v49 = vpop.f32.mrf.mxu0  ;;  %2408 = vlog2.f32 %v1387_v24 }
 0x1b1   :  { %v2395_v31 = vpop.f32.mrf.mxu1 }
 0x1b3   :  { %v1333_v43 = vpop.f32.mrf.mxu1 }
 0x1b5   :  { %v2398_v59 = vpop.f32.mrf.mxu1 }
 0x1b7   :  { %v1345_v1 = vpop.f32.mrf.mxu1 }
 0x1bd   :  { %v2409_v30 = vpop.eup %2408 }
 0x1be   :  { %v1404_v5 = vmul.f32 0.6931472, %v2409_v30 }
 0x1c0   :  { %v1855_v29 = vadd.f32 -9.999995e-07, %v1404_v5  ;;  %v1618_v58 = vsub.f32 9.999995e-07, %v1404_v5 }
 0x1c2   :  { %v1634_v8 = vsel %vm1586_vm2, %v1855_v29, %v1618_v58 }
 0x1c3   :  { %v1768_v0 = vsel %vm1752_vm3, %v1634_v8, 0.0 }
 0x1c4   :  { %1801 = vst [vmem:[#allocation5] sm:$0xff] %v1768_v0 }
 0x1c5   :  { %2441 = shalt.err (!%p2438_p9)
}
 0x1c6   :  { %1832 = dma.vmem_to_hbm [thread:$0]  %s1830_s28, 128, %s3108_s4, [#allocation4]  }
 0x1c7   :  { %2452 = dma.done.wait [#allocation4], 128  }
 0x1c8   :  { %2453 = vsyncadd [#allocation4], 4294967168 }
 0x1c9   :  { %1836 = vsyncpa [#allocation3], 1 }
 0x1ca   :  { %1837 = vsyncpa [#allocation4], 1 }

</bundles_post_ra>
